<compile_context>
chip_gen: v6e
topology: v6e:2x2x1
jax: 0.10.0
libtpu: 0.0.40
codegen_flags: <defaults>
</compile_context>

<pallas_src>
import math

import numpy as np
import jax
import jax.numpy as jnp
from jax.experimental import pallas as pl
from jax.experimental.pallas import tpu as pltpu

# ---- problem sizes (small, consistent with the module) ----
B, S, D = 2, 8, 32          # batch, seq_len, d_model
H = 8                       # n_heads
NQ = 8                      # n_qubits
DH = D // H                 # head dim
NOISE_LEVEL = 0.01

BS = B * S                  # batch*seq folded into sublanes (16)
HBS = H * BS                # stacked-head rows (128)
NEG = -1e30                 # off-block mask value (exp underflows to 0 in f32)


def _mm_nt(a, b):
    """a @ b.T (contract last dims of both operands), f32 accumulation."""
    return jax.lax.dot_general(
        a, b, (((1,), (1,)), ((), ())), preferred_element_type=jnp.float32)


def _softmax_rows(s):
    """Row softmax; normalization via EUP approx-reciprocal (free slot)."""
    m = jnp.max(s, axis=-1, keepdims=True)
    e = jnp.exp(s - m)
    return e * pl.reciprocal(jnp.sum(e, axis=-1, keepdims=True), approx=True)


def qmsa_kernel(x_ref, noise_ref, w_in_ref, b_in_ref, wo_ref, bo_ref,
                head_mask_ref, score_mask_ref, qw_ref, o_ref):
    x = x_ref[...]                                            # (BS, D) both batches

    # ---- single fused input projection: [state_prep | Q*scale | K | V] ----
    proj = jnp.dot(x, w_in_ref[...],
                   preferred_element_type=jnp.float32) + b_in_ref[...]   # (BS, 112)
    sp = proj[:, :2 * NQ]                                     # (BS, 16)
    q = proj[:, 2 * NQ:2 * NQ + D]                            # scale pre-folded
    k = proj[:, 2 * NQ + D:2 * NQ + 2 * D]
    v = proj[:, 2 * NQ + 2 * D:]

    # ---------------- quantum mixed-state branch ----------------
    # normalize the complex amplitudes: |re|^2 + |im|^2 == sum(sp^2)
    sumsq = jnp.sum(sp * sp, axis=-1, keepdims=True)
    sp_n = sp * jax.lax.rsqrt(sumsq + 1e-12)                  # single EUP op
    re = sp_n[:, :NQ]
    im = sp_n[:, NQ:]

    # one fused Gram matmul for the complex overlap:
    #   G = [re;im] @ [re;im]^T,  Re<i|j> = G[:BS,:BS]+G[BS:,BS:],
    #                             Im<i|j> = G[:BS,BS:]-G[BS:,:BS]
    st = jnp.concatenate([re, im], axis=0)                    # (2*BS, NQ)
    g = _mm_nt(st, st)                                        # (2*BS, 2*BS)
    ov_re = g[:BS, :BS] + g[BS:, BS:]
    ov_im = g[:BS, BS:] - g[BS:, :BS]

    # noise_ref holds gaussian noise on the per-batch diagonal blocks and
    # -1e30 off-block, so the single row-softmax stays confined to each batch.
    qa = ov_re * ov_re + ov_im * ov_im + noise_ref[...]
    qa = _softmax_rows(qa)                                    # (BS, BS)
    q_out = jnp.dot(qa, x, preferred_element_type=jnp.float32)        # (BS, D)

    # ---------------- classical multi-head attention branch ----------------
    head_mask = head_mask_ref[...]                            # (HBS, D) constant
    # stacked-head attention: one score matmul, one softmax, one A@V matmul.
    # broadcast + leading-dim merge is layout-free (no 8-way sublane concat).
    q_stack = jnp.broadcast_to(q, (H, BS, D)).reshape(HBS, D) * head_mask
    scores = _mm_nt(q_stack, k) + score_mask_ref[...]         # (HBS, BS)
    a_all = _softmax_rows(scores)
    p = jnp.dot(a_all, v, preferred_element_type=jnp.float32) # (HBS, D)
    pm = p * head_mask                                        # keep own head cols

    mha = pm[0:BS]                                            # (BS, D)
    for h in range(1, H):                                     # cheap VPU adds
        mha = mha + pm[h * BS:(h + 1) * BS]

    c_out = jnp.dot(mha, wo_ref[...],
                    preferred_element_type=jnp.float32) + bo_ref[...]

    # ---------------- sigmoid-weighted mix ----------------
    w = qw_ref[0]                                             # sigmoid(quantum_weight)
    o_ref[...] = w * q_out + (1.0 - w) * c_out


def prepare_params(wsp, bsp, wqkv, bqkv, wo, bo):
    """One-time (init) weight prep: transpose, fuse projections, fold the
    1/sqrt(head_dim) scale into the Q columns, and build constant masks."""
    scale = 1.0 / math.sqrt(DH)
    wqkv_t = jnp.transpose(wqkv)                              # (D, 3D)
    w_in = jnp.concatenate(
        [wsp, wqkv_t[:, :D] * scale, wqkv_t[:, D:2 * D], wqkv_t[:, 2 * D:]],
        axis=1).astype(jnp.float32)                           # (D, 2*NQ + 3D) = (32, 112)
    b_in = jnp.concatenate(
        [bsp, bqkv[:, :D] * scale, bqkv[:, D:2 * D], bqkv[:, 2 * D:]],
        axis=1).astype(jnp.float32)                           # (1, 112)

    # head_mask[r, c] = 1 iff column c belongs to head (r // BS)
    row_head = np.arange(HBS)[:, None] // BS
    col_head = np.arange(D)[None, :] // DH
    head_mask = (row_head == col_head).astype(np.float32)     # (HBS, D)

    # score_mask keeps each (head, query) row attending within its own batch
    row_b = (np.arange(HBS)[:, None] % BS) // S
    col_b = np.arange(BS)[None, :] // S
    score_mask = np.where(row_b == col_b, 0.0, NEG).astype(np.float32)  # (HBS, BS)

    return dict(
        w_in=w_in,
        b_in=b_in,
        wo_t=jnp.transpose(wo).astype(jnp.float32),           # (D, D)
        bo=bo.astype(jnp.float32),                            # (1, D)
        head_mask=jnp.asarray(head_mask),
        score_mask=jnp.asarray(score_mask),
    )


@jax.jit
def qmsa_forward(x, noise, params, qw_sig):
    # Fold (B, S) into sublanes; build block-diagonal noise with -1e30 off the
    # per-batch blocks (cheap XLA-side layout plumbing, fused under jit).
    x_flat = x.reshape(BS, D).astype(jnp.float32)
    neg = jnp.full((S, S), NEG, jnp.float32)
    rows = [jnp.concatenate(
        [noise[b].astype(jnp.float32) if bb == b else neg for bb in range(B)],
        axis=1) for b in range(B)]
    noise_bd = jnp.concatenate(rows, axis=0)                  # (BS, BS)

    out = pl.pallas_call(
        qmsa_kernel,
        out_shape=jax.ShapeDtypeStruct((BS, D), jnp.float32),
        in_specs=[
            pl.BlockSpec(memory_space=pltpu.MemorySpace.VMEM),   # x_flat
            pl.BlockSpec(memory_space=pltpu.MemorySpace.VMEM),   # noise (block-diag)
            pl.BlockSpec(memory_space=pltpu.MemorySpace.VMEM),   # fused in-proj W
            pl.BlockSpec(memory_space=pltpu.MemorySpace.VMEM),   # fused in-proj b
            pl.BlockSpec(memory_space=pltpu.MemorySpace.VMEM),   # out_proj W^T
            pl.BlockSpec(memory_space=pltpu.MemorySpace.VMEM),   # out_proj b
            pl.BlockSpec(memory_space=pltpu.MemorySpace.VMEM),   # head_mask const
            pl.BlockSpec(memory_space=pltpu.MemorySpace.VMEM),   # score_mask const
            pl.BlockSpec(memory_space=pltpu.MemorySpace.SMEM),   # sigmoid(qw)
        ],
        out_specs=pl.BlockSpec(memory_space=pltpu.MemorySpace.VMEM),
    )(x_flat, noise_bd, params["w_in"], params["b_in"], params["wo_t"],
      params["bo"], params["head_mask"], params["score_mask"], qw_sig)

    return out.reshape(B, S, D)


def qmsa_reference(x, noise, wsp, bsp, wqkv, bqkv, wo, bo, qw_sig):
    """Pure-JAX reference matching the PyTorch forward semantics."""
    sp = jnp.einsum('bsd,dn->bsn', x, wsp) + bsp
    re, im = sp[..., :NQ], sp[..., NQ:]
    amp = re + 1j * im
    amp = amp / (jnp.linalg.norm(amp, axis=-1, keepdims=True) + 1e-8)
    ov = jnp.einsum('bik,bjk->bij', jnp.conj(amp), amp)
    qa = jnp.abs(ov) ** 2 + noise
    qa = jax.nn.softmax(qa, axis=-1)
    q_out = jnp.einsum('bij,bjd->bid', qa, x)

    qkv = jnp.einsum('bsd,ed->bse', x, wqkv) + bqkv
    q, k, v = qkv[..., :D], qkv[..., D:2 * D], qkv[..., 2 * D:]

    def split(t):
        return t.reshape(B, S, H, DH).transpose(0, 2, 1, 3)

    qh, kh, vh = split(q), split(k), split(v)
    s = jnp.einsum('bhqd,bhkd->bhqk', qh, kh) / math.sqrt(DH)
    a = jax.nn.softmax(s, axis=-1)
    oh = jnp.einsum('bhqk,bhkd->bhqd', a, vh)
    o = oh.transpose(0, 2, 1, 3).reshape(B, S, D)
    c_out = jnp.einsum('bsd,ed->bse', o, wo) + bo

    w = qw_sig[0]
    return w * q_out + (1.0 - w) * c_out


if __name__ == "__main__":
    key = jax.random.PRNGKey(0)
    keys = jax.random.split(key, 8)

    # deterministic inputs / parameters (shapes follow the PyTorch module)
    x = jax.random.normal(keys[0], (B, S, D), jnp.float32)
    # TODO(synk): torch.randn_like per-call noise is replaced by this
    # deterministic input tensor (documented semantic difference).
    noise = jax.random.normal(keys[1], (B, S, S), jnp.float32) * NOISE_LEVEL

    wsp = jax.random.normal(keys[2], (D, 2 * NQ), jnp.float32) / math.sqrt(D)
    bsp = jax.random.normal(keys[3], (1, 2 * NQ), jnp.float32) * 0.01
    wqkv = jax.random.normal(keys[4], (3 * D, D), jnp.float32) / math.sqrt(D)
    bqkv = jax.random.normal(keys[5], (1, 3 * D), jnp.float32) * 0.01
    wo = jax.random.normal(keys[6], (D, D), jnp.float32) / math.sqrt(D)
    bo = jax.random.normal(keys[7], (1, D), jnp.float32) * 0.01
    qw_sig = jnp.asarray([jax.nn.sigmoid(0.5)], jnp.float32)  # sigmoid(quantum_weight)

    # init-time weight prep (runs once, outside the per-call path)
    params = prepare_params(wsp, bsp, wqkv, bqkv, wo, bo)

    out = qmsa_forward(x, noise, params, qw_sig)
    out = jax.block_until_ready(out)

    ref = qmsa_reference(x, noise, wsp, bsp, wqkv, bqkv, wo, bo, qw_sig)
    ref = jax.block_until_ready(ref)

    assert out.shape == (B, S, D)
    assert bool(jnp.all(jnp.isfinite(out)))
    assert bool(jnp.allclose(out, ref, atol=5e-2, rtol=5e-2)), (
        f"max abs diff {float(jnp.max(jnp.abs(out - ref)))}")

    print("KERNEL_OK")
</pallas_src>

<mosaic_0001>
module attributes {stable_mosaic.version = 11 : i64} {
  func.func @qmsa_kernel(%arg0: memref<16x32xf32, #tpu.memory_space<vmem>>, %arg1: memref<16x16xf32, #tpu.memory_space<vmem>>, %arg2: memref<32x112xf32, #tpu.memory_space<vmem>>, %arg3: memref<1x112xf32, #tpu.memory_space<vmem>>, %arg4: memref<32x32xf32, #tpu.memory_space<vmem>>, %arg5: memref<1x32xf32, #tpu.memory_space<vmem>>, %arg6: memref<128x32xf32, #tpu.memory_space<vmem>>, %arg7: memref<128x16xf32, #tpu.memory_space<vmem>>, %arg8: memref<1xf32, #tpu.memory_space<smem>>, %arg9: memref<16x32xf32, #tpu.memory_space<vmem>>) attributes {dimension_semantics = [], scalar_prefetch = 0 : i64, scratch_operands = 0 : i64, tpu.core_type = #tpu.core_type<tc>} {
    %c0 = arith.constant 0 : index
    %c0_0 = arith.constant 0 : index
    %0 = vector.load %arg0[%c0, %c0_0] : memref<16x32xf32, #tpu.memory_space<vmem>>, vector<16x32xf32>
    %c0_1 = arith.constant 0 : index
    %c0_2 = arith.constant 0 : index
    %1 = vector.load %arg2[%c0_1, %c0_2] : memref<32x112xf32, #tpu.memory_space<vmem>>, vector<32x112xf32>
    %cst = arith.constant dense<0.000000e+00> : vector<16x112xf32>
    %2 = tpu.matmul %0, %1, %cst {dimension_numbers = #tpu.dot_dimension_numbers<[1], [0], [0], [1], [0, 0, 1, 1], [], []>} : vector<16x32xf32>, vector<32x112xf32>, vector<16x112xf32> -> vector<16x112xf32>
    %c0_3 = arith.constant 0 : index
    %c0_4 = arith.constant 0 : index
    %3 = vector.load %arg3[%c0_3, %c0_4] : memref<1x112xf32, #tpu.memory_space<vmem>>, vector<1x112xf32>
    %4 = vector.broadcast %3 : vector<1x112xf32> to vector<16x112xf32>
    %5 = arith.addf %2, %4 : vector<16x112xf32>
    %6 = vector.extract_strided_slice %5 {offsets = [0, 0], sizes = [16, 16], strides = [1, 1]} : vector<16x112xf32> to vector<16x16xf32>
    %7 = vector.extract_strided_slice %5 {offsets = [0, 16], sizes = [16, 32], strides = [1, 1]} : vector<16x112xf32> to vector<16x32xf32>
    %8 = vector.extract_strided_slice %5 {offsets = [0, 48], sizes = [16, 32], strides = [1, 1]} : vector<16x112xf32> to vector<16x32xf32>
    %9 = vector.extract_strided_slice %5 {offsets = [0, 80], sizes = [16, 32], strides = [1, 1]} : vector<16x112xf32> to vector<16x32xf32>
    %10 = arith.mulf %6, %6 : vector<16x16xf32>
    %cst_5 = arith.constant dense<0.000000e+00> : vector<16xf32>
    %11 = vector.multi_reduction <add>, %10, %cst_5 [1] : vector<16x16xf32> to vector<16xf32>
    %12 = vector.shape_cast %11 : vector<16xf32> to vector<16x1xf32>
    %cst_6 = arith.constant 9.99999996E-13 : f32
    %13 = vector.broadcast %cst_6 : f32 to vector<16x1xf32>
    %14 = arith.addf %12, %13 : vector<16x1xf32>
    %15 = math.rsqrt %14 : vector<16x1xf32>
    %16 = vector.broadcast %15 : vector<16x1xf32> to vector<16x16xf32>
    %17 = arith.mulf %6, %16 : vector<16x16xf32>
    %18 = vector.extract_strided_slice %17 {offsets = [0, 0], sizes = [16, 8], strides = [1, 1]} : vector<16x16xf32> to vector<16x8xf32>
    %19 = vector.extract_strided_slice %17 {offsets = [0, 8], sizes = [16, 8], strides = [1, 1]} : vector<16x16xf32> to vector<16x8xf32>
    %20 = tpu.concatenate %18, %19 in 0 : vector<16x8xf32>, vector<16x8xf32> -> vector<32x8xf32>
    %cst_7 = arith.constant dense<0.000000e+00> : vector<32x32xf32>
    %21 = tpu.matmul %20, %20, %cst_7 {dimension_numbers = #tpu.dot_dimension_numbers<[1], [1], [0], [0], [0, 0, 1, 0], [], []>} : vector<32x8xf32>, vector<32x8xf32>, vector<32x32xf32> -> vector<32x32xf32>
    %22 = vector.extract_strided_slice %21 {offsets = [0, 0], sizes = [16, 16], strides = [1, 1]} : vector<32x32xf32> to vector<16x16xf32>
    %23 = vector.extract_strided_slice %21 {offsets = [16, 16], sizes = [16, 16], strides = [1, 1]} : vector<32x32xf32> to vector<16x16xf32>
    %24 = arith.addf %22, %23 : vector<16x16xf32>
    %25 = vector.extract_strided_slice %21 {offsets = [0, 16], sizes = [16, 16], strides = [1, 1]} : vector<32x32xf32> to vector<16x16xf32>
    %26 = vector.extract_strided_slice %21 {offsets = [16, 0], sizes = [16, 16], strides = [1, 1]} : vector<32x32xf32> to vector<16x16xf32>
    %27 = arith.subf %25, %26 : vector<16x16xf32>
    %28 = arith.mulf %24, %24 : vector<16x16xf32>
    %29 = arith.mulf %27, %27 : vector<16x16xf32>
    %30 = arith.addf %28, %29 : vector<16x16xf32>
    %c0_8 = arith.constant 0 : index
    %c0_9 = arith.constant 0 : index
    %31 = vector.load %arg1[%c0_8, %c0_9] : memref<16x16xf32, #tpu.memory_space<vmem>>, vector<16x16xf32>
    %32 = arith.addf %30, %31 : vector<16x16xf32>
    %cst_10 = arith.constant dense<0xFF800000> : vector<16xf32>
    %33 = vector.multi_reduction <maximumf>, %32, %cst_10 [1] : vector<16x16xf32> to vector<16xf32>
    %34 = vector.shape_cast %33 : vector<16xf32> to vector<16x1xf32>
    %35 = vector.broadcast %34 : vector<16x1xf32> to vector<16x16xf32>
    %36 = arith.subf %32, %35 : vector<16x16xf32>
    %37 = math.exp %36 : vector<16x16xf32>
    %cst_11 = arith.constant dense<0.000000e+00> : vector<16xf32>
    %38 = vector.multi_reduction <add>, %37, %cst_11 [1] : vector<16x16xf32> to vector<16xf32>
    %39 = vector.shape_cast %38 : vector<16xf32> to vector<16x1xf32>
    %40 = tpu.reciprocal %39 {approx = true} : vector<16x1xf32> -> vector<16x1xf32>
    %41 = vector.broadcast %40 : vector<16x1xf32> to vector<16x16xf32>
    %42 = arith.mulf %37, %41 : vector<16x16xf32>
    %cst_12 = arith.constant dense<0.000000e+00> : vector<16x32xf32>
    %43 = tpu.matmul %42, %0, %cst_12 {dimension_numbers = #tpu.dot_dimension_numbers<[1], [0], [0], [1], [0, 0, 1, 1], [], []>} : vector<16x16xf32>, vector<16x32xf32>, vector<16x32xf32> -> vector<16x32xf32>
    %c0_13 = arith.constant 0 : index
    %c0_14 = arith.constant 0 : index
    %44 = vector.load %arg6[%c0_13, %c0_14] : memref<128x32xf32, #tpu.memory_space<vmem>>, vector<128x32xf32>
    %45 = vector.shape_cast %7 : vector<16x32xf32> to vector<1x16x32xf32>
    %46 = vector.broadcast %45 : vector<1x16x32xf32> to vector<8x16x32xf32>
    %47 = vector.shape_cast %46 : vector<8x16x32xf32> to vector<128x32xf32>
    %48 = arith.mulf %47, %44 : vector<128x32xf32>
    %cst_15 = arith.constant dense<0.000000e+00> : vector<128x16xf32>
    %49 = tpu.matmul %48, %8, %cst_15 {dimension_numbers = #tpu.dot_dimension_numbers<[1], [1], [0], [0], [0, 0, 1, 0], [], []>} : vector<128x32xf32>, vector<16x32xf32>, vector<128x16xf32> -> vector<128x16xf32>
    %c0_16 = arith.constant 0 : index
    %c0_17 = arith.constant 0 : index
    %50 = vector.load %arg7[%c0_16, %c0_17] : memref<128x16xf32, #tpu.memory_space<vmem>>, vector<128x16xf32>
    %51 = arith.addf %49, %50 : vector<128x16xf32>
    %cst_18 = arith.constant dense<0xFF800000> : vector<128xf32>
    %52 = vector.multi_reduction <maximumf>, %51, %cst_18 [1] : vector<128x16xf32> to vector<128xf32>
    %53 = vector.shape_cast %52 : vector<128xf32> to vector<128x1xf32>
    %54 = vector.broadcast %53 : vector<128x1xf32> to vector<128x16xf32>
    %55 = arith.subf %51, %54 : vector<128x16xf32>
    %56 = math.exp %55 : vector<128x16xf32>
    %cst_19 = arith.constant dense<0.000000e+00> : vector<128xf32>
    %57 = vector.multi_reduction <add>, %56, %cst_19 [1] : vector<128x16xf32> to vector<128xf32>
    %58 = vector.shape_cast %57 : vector<128xf32> to vector<128x1xf32>
    %59 = tpu.reciprocal %58 {approx = true} : vector<128x1xf32> -> vector<128x1xf32>
    %60 = vector.broadcast %59 : vector<128x1xf32> to vector<128x16xf32>
    %61 = arith.mulf %56, %60 : vector<128x16xf32>
    %cst_20 = arith.constant dense<0.000000e+00> : vector<128x32xf32>
    %62 = tpu.matmul %61, %9, %cst_20 {dimension_numbers = #tpu.dot_dimension_numbers<[1], [0], [0], [1], [0, 0, 1, 1], [], []>} : vector<128x16xf32>, vector<16x32xf32>, vector<128x32xf32> -> vector<128x32xf32>
    %63 = arith.mulf %62, %44 : vector<128x32xf32>
    %64 = vector.extract_strided_slice %63 {offsets = [0, 0], sizes = [16, 32], strides = [1, 1]} : vector<128x32xf32> to vector<16x32xf32>
    %65 = vector.extract_strided_slice %63 {offsets = [16, 0], sizes = [16, 32], strides = [1, 1]} : vector<128x32xf32> to vector<16x32xf32>
    %66 = arith.addf %64, %65 : vector<16x32xf32>
    %67 = vector.extract_strided_slice %63 {offsets = [32, 0], sizes = [16, 32], strides = [1, 1]} : vector<128x32xf32> to vector<16x32xf32>
    %68 = arith.addf %66, %67 : vector<16x32xf32>
    %69 = vector.extract_strided_slice %63 {offsets = [48, 0], sizes = [16, 32], strides = [1, 1]} : vector<128x32xf32> to vector<16x32xf32>
    %70 = arith.addf %68, %69 : vector<16x32xf32>
    %71 = vector.extract_strided_slice %63 {offsets = [64, 0], sizes = [16, 32], strides = [1, 1]} : vector<128x32xf32> to vector<16x32xf32>
    %72 = arith.addf %70, %71 : vector<16x32xf32>
    %73 = vector.extract_strided_slice %63 {offsets = [80, 0], sizes = [16, 32], strides = [1, 1]} : vector<128x32xf32> to vector<16x32xf32>
    %74 = arith.addf %72, %73 : vector<16x32xf32>
    %75 = vector.extract_strided_slice %63 {offsets = [96, 0], sizes = [16, 32], strides = [1, 1]} : vector<128x32xf32> to vector<16x32xf32>
    %76 = arith.addf %74, %75 : vector<16x32xf32>
    %77 = vector.extract_strided_slice %63 {offsets = [112, 0], sizes = [16, 32], strides = [1, 1]} : vector<128x32xf32> to vector<16x32xf32>
    %78 = arith.addf %76, %77 : vector<16x32xf32>
    %c0_21 = arith.constant 0 : index
    %c0_22 = arith.constant 0 : index
    %79 = vector.load %arg4[%c0_21, %c0_22] : memref<32x32xf32, #tpu.memory_space<vmem>>, vector<32x32xf32>
    %cst_23 = arith.constant dense<0.000000e+00> : vector<16x32xf32>
    %80 = tpu.matmul %78, %79, %cst_23 {dimension_numbers = #tpu.dot_dimension_numbers<[1], [0], [0], [1], [0, 0, 1, 1], [], []>} : vector<16x32xf32>, vector<32x32xf32>, vector<16x32xf32> -> vector<16x32xf32>
    %c0_24 = arith.constant 0 : index
    %c0_25 = arith.constant 0 : index
    %81 = vector.load %arg5[%c0_24, %c0_25] : memref<1x32xf32, #tpu.memory_space<vmem>>, vector<1x32xf32>
    %82 = vector.broadcast %81 : vector<1x32xf32> to vector<16x32xf32>
    %83 = arith.addf %80, %82 : vector<16x32xf32>
    %c0_26 = arith.constant 0 : index
    %84 = memref.load %arg8[%c0_26] : memref<1xf32, #tpu.memory_space<smem>>
    %85 = vector.broadcast %84 : f32 to vector<16x32xf32>
    %86 = arith.mulf %85, %43 : vector<16x32xf32>
    %cst_27 = arith.constant 1.000000e+00 : f32
    %87 = arith.subf %cst_27, %84 : f32
    %88 = vector.broadcast %87 : f32 to vector<16x32xf32>
    %89 = arith.mulf %88, %83 : vector<16x32xf32>
    %90 = arith.addf %86, %89 : vector<16x32xf32>
    %c0_28 = arith.constant 0 : index
    %c0_29 = arith.constant 0 : index
    %91 = vector.load %arg9[%c0_28, %c0_29] : memref<16x32xf32, #tpu.memory_space<vmem>>, vector<16x32xf32>
    tpu.vector_store %arg9[%c0_28, %c0_29], %90 {strides = array<i32>} : memref<16x32xf32, #tpu.memory_space<vmem>>, vector<16x32xf32>,
    return
  }
}

</mosaic_0001>

<bundles_post_ra>
// kernel: qmsa_forward.1
= control target key start
LH: loop header
LB: loop body
LE: loop exit
PB: predicated region body
PF: predicated region fallthrough
CT: control target
= control target key end

     0   :  { %vm47_vm0 = vcmask 261120   ;;  %s2143_s0 = inlined_call_operand.vmem [shape: f32[16,32], index: 0, kind: input, shape index: {}]   ;;  %s2144_s1 = inlined_call_operand.vmem [shape: f32[16,16], index: 1, kind: input, shape index: {}]   ;;  %s2145_s2 = inlined_call_operand.vmem [shape: f32[32,112], index: 2, kind: input, shape index: {}]   ;;  %s2146_s3 = inlined_call_operand.vmem [shape: f32[1,112], index: 3, kind: input, shape index: {}]   ;;  %s2147_s4 = inlined_call_operand.vmem [shape: f32[32,32], index: 4, kind: input, shape index: {}]   ;;  %s2148_s5 = inlined_call_operand.vmem [shape: f32[1,32], index: 5, kind: input, shape index: {}]   ;;  %s2149_s6 = inlined_call_operand.vmem [shape: f32[128,32], index: 6, kind: input, shape index: {}]   ;;  %s2150_s7 = inlined_call_operand.vmem [shape: f32[128,16], index: 7, kind: input, shape index: {}]   ;;  %s2151_s8 = inlined_call_operand.<no memory space> [shape: f32[1], index: 8, kind: input, shape index: {}]   ;;  %s2152_s9 = inlined_call_operand.hbm [shape: f32[16,32], index: 9, kind: output, shape index: {}]  }
   0x1   :  { %v39_v0 = vld [vmem:[%s2145_s2 + $0x18] sm:$0xff]  ;;  %v38_v1 = vld [vmem:[%s2145_s2 + $0x10] sm:$0xff]  ;;  %v34_v2 = vld [vmem:[%s2143_s0] sm:$0xff] }
   0x2   :  { %1365 = vmatprep.subr.mxu0 %v39_v0  ;;  %v37_v3 = vld [vmem:[%s2145_s2 + $0x8] sm:$0xff]  ;;  %1373 = vmatprep.mubr.msk.f32.mxu0 %vm47_vm0, %v34_v2 }
   0x3   :  { %1366 = vmatpush3.msra.mxu0 %v39_v0 }
   0x4   :  { %15 = vsyncpa [#allocation4], 0  ;;  %1367 = vmatprep.subr.mxu0 %v38_v1  ;;  %v36_v4 = vld [vmem:[%s2145_s2] sm:$0xff]  ;;  %v35_v5 = vld [vmem:[%s2143_s0 + $0x8] sm:$0xff]  ;;  %vm131_vm1 = vcmask 130048   ;;  %s1570_s0 = smov 120  }
   0x5   :  { %1368 = vmatpush3.msra.mxu0 %v38_v1  ;;  %v1255_v6 = vld [vmem:[%s2146_s3] ss:$0 sm:$0xff]  ;;  %vm150_vm2 = vcmask 64512   ;;  %s1571_s2 = smov 16   ;;  %s1572_s3 = smov 112   ;;  %v277_v46 = vld [vmem:[%s2144_s1 + $0x8] sm:$0xff] }
   0x6   :  { %1369 = vmatprep.subr.mxu0 %v37_v3  ;;  %v276_v41 = vld [vmem:[%s2144_s1] sm:$0xff]  ;;  %v1692_v51 = vld [vmem:[%s2149_s6 + $0x8] sm:$0xff]  ;;  %v1699_v52 = vld [vmem:[%s2149_s6 + $0x10] sm:$0xff]  ;;  %s1231_s26 = ssub.f32 1.0, %s2151_s8  ;;  %s1575_s1 = smov [#allocation3]  }
   0x7   :  { %1370 = vmatpush3.msra.mxu0 %v37_v3  ;;  %v1706_v53 = vld [vmem:[%s2149_s6 + $0x20] sm:$0xff]  ;;  %v1720_v55 = vld [vmem:[%s2149_s6 + $0x30] sm:$0xff]  ;;  %v1725_v56 = vld [vmem:[%s2149_s6 + $0x18] sm:$0xff]  ;;  %s1244_s10 = sshll.u32 %s1575_s1, 4  ;;  %s1245_s10 = int_to_ptr.vmem [resolvable:$true] %s1244_s10 }
   0x8   :  { %1371 = vmatprep.subr.mxu0 %v36_v4  ;;  %v1711_v54 = vld [vmem:[%s2149_s6] sm:$0xff]  ;;  %v1739_v58 = vld [vmem:[%s2149_s6 + $0x28] sm:$0xff]  ;;  %v1748_v59 = vld [vmem:[%s2149_s6 + $0x50] sm:$0xff]  ;;  %p1553_p1 = scmp.lt.s32.totalorder %s1245_s10, %s1245_s10 }
   0x9   :  { %1372 = vmatpush3.msra.mxu0 %v36_v4  ;;  %v1734_v57 = vld [vmem:[%s2149_s6 + $0x40] sm:$0xff]  ;;  %v1753_v60 = vld [vmem:[%s2149_s6 + $0x38] sm:$0xff]  ;;  %v1767_v62 = vld [vmem:[%s2149_s6 + $0x48] sm:$0xff] }
   0xa   :  { %1374 = vmatmul.mubr.msk.f32.vlgmr.msra.gmra.mxu0 %vm47_vm0, %v35_v5  ;;  %1390 = vmatprep.subr.mxu0 %v35_v5  ;;  %v1762_v61 = vld [vmem:[%s2149_s6 + $0x60] sm:$0xff]  ;;  %v1776_v63 = vld [vmem:[%s2149_s6 + $0x68] sm:$0xff]  ;;  %v1781_v0 = vld [vmem:[%s2149_s6 + $0x58] sm:$0xff] }
   0xb   :  { %1391 = vmatpush3.msra.mxu0 %v35_v5  ;;  %v1790_v1 = vld [vmem:[%s2149_s6 + $0x78] sm:$0xff] }
   0xc   :  { %1392 = vmatprep.subr.mxu0 %v34_v2 }
   0xd   :  { %1393 = vmatpush3.msra.mxu0 %v34_v2  ;;  %v1795_v2 = vld [vmem:[%s2149_s6 + $0x70] sm:$0xff]  ;;  %s1573_s6 = smov 80  }
  0xca   :  { %v1375_v7 = vpop.f32.mrf.mxu0 }
  0xcb   :  { %v1651_v8 = vadd.f32 %v1375_v7, %v1255_v6 }
  0xcc   :  { %v120_v9 = vpop.f32.mrf.mxu0 }
  0xcd   :  { %v1653_v10 = vadd.f32 %v1255_v6, %v120_v9  ;;  %v130_v11 = vmul.f32 %v1651_v8, %v1651_v8 }
  0xcf   :  { %v135_v12 = vsel %vm131_vm1, %v130_v11, 0.0  ;;  %v129_v13 = vmul.f32 %v1653_v10, %v1653_v10 }
  0xd0   :  { %136 = vadd.xlane.f32.xlu0 %v135_v12 }
  0xd1   :  { %v132_v14 = vsel %vm131_vm1, %v129_v13, 0.0 }
  0xd4   :  { %133 = vadd.xlane.f32.xlu0 %v132_v14 }
 0x159   :  { %v137_v15 = vpop.xlane.xlu0 %136 }
 0x15a   :  { %v139_v16 = vadd.f32 1e-12, %v137_v15 }
 0x15c   :  { %1472 = vrsqrt.f32 %v139_v16 }
 0x15d   :  { %v134_v17 = vpop.xlane.xlu0 %133 }
 0x15e   :  { %v138_v18 = vadd.f32 1e-12, %v134_v17 }
 0x160   :  { %1474 = vrsqrt.f32 %v138_v18 }
 0x169   :  { %v1473_v19 = vpop.eup %1472 }
 0x16a   :  { %v143_v20 = vmul.f32 %v1473_v19, %v1651_v8 }
 0x16c   :  { %148 = vrot.lane.b32.xlu1 %v143_v20, %s1570_s0 }
 0x16d   :  { %v1475_v21 = vpop.eup %1474 }
 0x16e   :  { %v142_v22 = vmul.f32 %v1475_v21, %v1653_v10 }
 0x170   :  { %146 = vrot.lane.b32.xlu1 %v142_v22, %s1570_s0  ;;  %1384 = vmatprep.mubr.msk.f32.mxu1 %vm150_vm2, %v142_v22 }
 0x1de   :  { %v149_v23 = vpop.permute.xlu1 %148 }
 0x1df   :  { %1376 = vmatprep.subr.msk.mxu1 %vm150_vm2, %v149_v23 }
 0x1e0   :  { %1377 = vmatpush3.xpose.msk.msra.mxu1 %vm150_vm2, %v149_v23 }
 0x1e2   :  { %v147_v24 = vpop.permute.xlu1 %146 }
 0x1e3   :  { %1378 = vmatprep.subr.msk.mxu1 %vm150_vm2, %v147_v24 }
 0x1e4   :  { %1379 = vmatpush3.xpose.msk.msra.mxu1 %vm150_vm2, %v147_v24 }
 0x1e5   :  { %1380 = vmatprep.subr.msk.mxu1 %vm150_vm2, %v143_v20 }
 0x1e8   :  { %1381 = vmatpush3.xpose.msk.msra.mxu1 %vm150_vm2, %v143_v20 }
 0x1e9   :  { %1382 = vmatprep.subr.msk.mxu1 %vm150_vm2, %v142_v22 }
 0x1ec   :  { %1383 = vmatpush3.xpose.msk.msra.mxu1 %vm150_vm2, %v142_v22 }
 0x1ef   :  { %1385 = vmatmul.mubr.msk.f32.vlgmr.msra.gmra.mxu1 %vm150_vm2, %v143_v20 }
 0x1f0   :  { %1387 = vmatprep.mubr.msk.f32.mxu1 %vm150_vm2, %v147_v24 }
 0x1f3   :  { %1388 = vmatmul.mubr.msk.f32.gmra.mxu1 %vm150_vm2, %v149_v23 }
 0x2af   :  { %v1386_v25 = vpop.f32.mrf.mxu1 }
 0x2b1   :  { %v225_v26 = vpop.f32.mrf.mxu1 }
 0x2b3   :  { %v1389_v27 = vpop.f32.mrf.mxu1 }
 0x2b4   :  { %256 = vrot.lane.b32.xlu1 %v1389_v27, %s1571_s2 }
 0x2b5   :  { %v235_v28 = vpop.f32.mrf.mxu1 }
 0x2b6   :  { %254 = vrot.lane.b32.xlu0 %v235_v28, %s1571_s2 }
 0x2b8   :  { %248 = vrot.lane.b32.xlu1 %v1389_v27, %s1572_s3 }
 0x2bc   :  { %246 = vrot.lane.b32.xlu1 %v235_v28, %s1572_s3 }
 0x326   :  { %v257_v29 = vpop.permute.xlu1 %256 }
 0x327   :  { %v261_v32 = vsub.f32 %v1386_v25, %v257_v29 }
 0x328   :  { %v255_v30 = vpop.permute.xlu0 %254 }
 0x329   :  { %v260_v31 = vsub.f32 %v225_v26, %v255_v30  ;;  %v265_v34 = vmul.f32 %v261_v32, %v261_v32 }
 0x32a   :  { %v249_v35 = vpop.permute.xlu1 %248 }
 0x32b   :  { %v264_v33 = vmul.f32 %v260_v31, %v260_v31  ;;  %v253_v38 = vadd.f32 %v1386_v25, %v249_v35 }
 0x32d   :  { %268 = vrot.lane.b32.xlu1 %v264_v33, %s1572_s3  ;;  %v263_v43 = vmul.f32 %v253_v38, %v253_v38 }
 0x32e   :  { %v247_v36 = vpop.permute.xlu1 %246 }
 0x32f   :  { %v252_v37 = vadd.f32 %v247_v36, %v225_v26 }
 0x331   :  { %270 = vrot.lane.b32.xlu1 %v265_v34, %s1572_s3  ;;  %v262_v39 = vmul.f32 %v252_v37, %v252_v37 }
 0x39f   :  { %v269_v40 = vpop.permute.xlu1 %268 }
 0x3a0   :  { %v274_v42 = vadd.f32 %v269_v40, %v262_v39 }
 0x3a2   :  { %v278_v44 = vadd.f32 %v276_v41, %v274_v42 }
 0x3a3   :  { %v271_v45 = vpop.permute.xlu1 %270 }
 0x3a4   :  { %v275_v47 = vadd.f32 %v271_v45, %v263_v43  ;;  %v280_v48 = vsel %vm131_vm1, %v278_v44, -inf }
 0x3a5   :  { %281 = vmax.xlane.f32.xlu1 %v280_v48 }
 0x3a6   :  { %v279_v49 = vadd.f32 %v277_v46, %v275_v47 }
 0x3a8   :  { %v283_v50 = vsel %vm131_vm1, %v279_v49, -inf }
 0x3a9   :  { %284 = vmax.xlane.f32.xlu0 %v283_v50 }
 0x3b6   :  { %417 = vrot.lane.b32.xlu1 %v1692_v51, %s1571_s2 }
 0x3ba   :  { %419 = vrot.lane.b32.xlu1 %v1699_v52, %s1571_s2 }
 0x3be   :  { %423 = vrot.lane.b32.xlu1 %v1706_v53, %s1571_s2 }
 0x3bf   :  { %415 = vrot.lane.b32.xlu0 %v1711_v54, %s1571_s2 }
 0x3c2   :  { %427 = vrot.lane.b32.xlu1 %v1720_v55, %s1571_s2 }
 0x3c3   :  { %421 = vrot.lane.b32.xlu0 %v1725_v56, %s1571_s2 }
 0x3c6   :  { %431 = vrot.lane.b32.xlu1 %v1734_v57, %s1571_s2 }
 0x3c7   :  { %425 = vrot.lane.b32.xlu0 %v1739_v58, %s1571_s2 }
 0x3ca   :  { %435 = vrot.lane.b32.xlu1 %v1748_v59, %s1571_s2 }
 0x3cb   :  { %429 = vrot.lane.b32.xlu0 %v1753_v60, %s1571_s2 }
 0x3ce   :  { %439 = vrot.lane.b32.xlu1 %v1762_v61, %s1571_s2 }
 0x3cf   :  { %433 = vrot.lane.b32.xlu0 %v1767_v62, %s1571_s2 }
 0x3d2   :  { %441 = vrot.lane.b32.xlu1 %v1776_v63, %s1571_s2 }
 0x3d3   :  { %437 = vrot.lane.b32.xlu0 %v1781_v0, %s1571_s2 }
 0x3d6   :  { %445 = vrot.lane.b32.xlu1 %v1790_v1, %s1571_s2 }
 0x3d7   :  { %443 = vrot.lane.b32.xlu0 %v1795_v2, %s1571_s2 }
 0x42e   :  { %v282_v3 = vpop.xlane.xlu1 %281 }
 0x42f   :  { %v286_v4 = vsub.f32 %v278_v44, %v282_v3 }
 0x431   :  { %v288_v5 = vmul.f32 1.442695, %v286_v4 }
 0x432   :  { %v285_v6 = vpop.xlane.xlu0 %284  ;;  %v418_v15 = vpop.permute.xlu1 %417 }
 0x433   :  { %1476 = vpow2.f32 %v288_v5  ;;  %v287_v7 = vsub.f32 %v279_v49, %v285_v6  ;;  %v464_v26 = vmul.f32 %v418_v15, %v1651_v8 }
 0x435   :  { %v290_v9 = vmul.f32 1.442695, %v287_v7 }
 0x436   :  { %v416_v16 = vpop.permute.xlu0 %415  ;;  %v420_v17 = vpop.permute.xlu1 %419 }
 0x437   :  { %1478 = vpow2.f32 %v290_v9  ;;  %v463_v20 = vmul.f32 %v416_v16, %v1653_v10  ;;  %v465_v23 = vmul.f32 %v420_v17, %v1653_v10 }
 0x43a   :  { %v422_v18 = vpop.permute.xlu0 %421  ;;  %v424_v19 = vpop.permute.xlu1 %423 }
 0x43b   :  { %v467_v25 = vmul.f32 %v424_v19, %v1653_v10  ;;  %v466_v29 = vmul.f32 %v422_v18, %v1651_v8 }
 0x43e   :  { %v426_v21 = vpop.permute.xlu0 %425  ;;  %v428_v22 = vpop.permute.xlu1 %427 }
 0x43f   :  { %v469_v28 = vmul.f32 %v428_v22, %v1653_v10  ;;  %v468_v33 = vmul.f32 %v426_v21, %v1651_v8 }
 0x440   :  { %v1801_v11 = vpop.eup %1476 }
 0x441   :  { %v292_v12 = vsel %vm131_vm1, %v1801_v11, 0.0 }
 0x442   :  { %293 = vadd.xlane.f32.xlu0 %v292_v12  ;;  %v430_v24 = vpop.permute.xlu0 %429  ;;  %v432_v27 = vpop.permute.xlu1 %431 }
 0x443   :  { %v471_v32 = vmul.f32 %v432_v27, %v1653_v10  ;;  %v470_v36 = vmul.f32 %v430_v24, %v1651_v8  ;;  %v480_v27 = vld [vmem:[%s2150_s7 + $0x8] sm:$0xff] }
 0x444   :  { %v1805_v13 = vpop.eup %1478 }
 0x445   :  { %v295_v14 = vsel %vm131_vm1, %v1805_v13, 0.0 }
 0x446   :  { %296 = vadd.xlane.f32.xlu1 %v295_v14  ;;  %v434_v30 = vpop.permute.xlu0 %433  ;;  %v436_v31 = vpop.permute.xlu1 %435 }
 0x447   :  { %v473_v35 = vmul.f32 %v436_v31, %v1653_v10  ;;  %v472_v39 = vmul.f32 %v434_v30, %v1651_v8 }
 0x44a   :  { %v438_v34 = vpop.permute.xlu0 %437  ;;  %v440_v37 = vpop.permute.xlu1 %439 }
 0x44b   :  { %v475_v38 = vmul.f32 %v440_v37, %v1653_v10  ;;  %v474_v43 = vmul.f32 %v438_v34, %v1651_v8 }
 0x44e   :  { %v444_v40 = vpop.permute.xlu0 %443  ;;  %v442_v42 = vpop.permute.xlu1 %441 }
 0x44f   :  { %v477_v41 = vmul.f32 %v444_v40, %v1653_v10  ;;  %v476_v44 = vmul.f32 %v442_v42, %v1651_v8  ;;  %v484_v40 = vld [vmem:[%s2150_s7 + $0x28] sm:$0xff] }
 0x452   :  { %v446_v45 = vpop.permute.xlu1 %445 }
 0x453   :  { %v478_v46 = vmul.f32 %v446_v45, %v1651_v8 }
 0x457   :  { %511 = vrot.lane.b32.xlu1 %v463_v20, %s1572_s3 }
 0x458   :  { %547 = vrot.lane.b32.xlu0 %v1651_v8, %s1573_s6 }
 0x45b   :  { %515 = vrot.lane.b32.xlu1 %v465_v23, %s1572_s3 }
 0x45c   :  { %545 = vrot.lane.b32.xlu0 %v1653_v10, %s1573_s6 }
 0x45f   :  { %519 = vrot.lane.b32.xlu1 %v467_v25, %s1572_s3 }
 0x460   :  { %513 = vrot.lane.b32.xlu0 %v464_v26, %s1572_s3 }
 0x463   :  { %523 = vrot.lane.b32.xlu1 %v469_v28, %s1572_s3 }
 0x464   :  { %517 = vrot.lane.b32.xlu0 %v466_v29, %s1572_s3  ;;  %v479_v29 = vld [vmem:[%s2150_s7] sm:$0xff] }
 0x467   :  { %527 = vrot.lane.b32.xlu1 %v471_v32, %s1572_s3  ;;  %v482_v32 = vld [vmem:[%s2150_s7 + $0x18] sm:$0xff] }
 0x468   :  { %521 = vrot.lane.b32.xlu0 %v468_v33, %s1572_s3 }
 0x46b   :  { %531 = vrot.lane.b32.xlu1 %v473_v35, %s1572_s3 }
 0x46c   :  { %525 = vrot.lane.b32.xlu0 %v470_v36, %s1572_s3  ;;  %v481_v36 = vld [vmem:[%s2150_s7 + $0x10] sm:$0xff] }
 0x46f   :  { %535 = vrot.lane.b32.xlu1 %v475_v38, %s1572_s3 }
 0x470   :  { %529 = vrot.lane.b32.xlu0 %v472_v39, %s1572_s3 }
 0x473   :  { %539 = vrot.lane.b32.xlu1 %v477_v41, %s1572_s3 }
 0x474   :  { %533 = vrot.lane.b32.xlu0 %v474_v43, %s1572_s3  ;;  %v483_v43 = vld [vmem:[%s2150_s7 + $0x20] sm:$0xff] }
 0x478   :  { %537 = vrot.lane.b32.xlu0 %v476_v44, %s1572_s3 }
 0x47c   :  { %541 = vrot.lane.b32.xlu0 %v478_v46, %s1572_s3 }
 0x4cb   :  { %v294_v47 = vpop.xlane.xlu0 %293 }
 0x4cc   :  { %1480 = vrcp.f32 %v294_v47 }
 0x4cf   :  { %v548_v48 = vpop.permute.xlu0 %547  ;;  %v297_v49 = vpop.xlane.xlu1 %296 }
 0x4d0   :  { %1482 = vrcp.f32 %v297_v49  ;;  %1397 = vmatprep.subr.msk.mxu0 %vm47_vm0, %v548_v48 }
 0x4d3   :  { %v546_v50 = vpop.permute.xlu0 %545  ;;  %v512_v3 = vpop.permute.xlu1 %511 }
 0x4d7   :  { %v514_v5 = vpop.permute.xlu0 %513  ;;  %v516_v7 = vpop.permute.xlu1 %515 }
 0x4d9   :  { %v1481_v4 = vpop.eup %1480 }
 0x4da   :  { %v300_v6 = vmul.f32 %v1481_v4, %v1801_v11 }
 0x4db   :  { %v518_v14 = vpop.permute.xlu0 %517  ;;  %v520_v15 = vpop.permute.xlu1 %519 }
 0x4dc   :  { %1394 = vmatprep.mubr.msk.f32.mxu0 %vm131_vm1, %v300_v6 }
 0x4dd   :  { %v1483_v9 = vpop.eup %1482 }
 0x4de   :  { %v301_v12 = vmul.f32 %v1483_v9, %v1805_v13  ;;  %v488_v9 = vld [vmem:[%s2150_s7 + $0x48] sm:$0xff] }
 0x4df   :  { %v522_v16 = vpop.permute.xlu0 %521  ;;  %v524_v11 = vpop.permute.xlu1 %523 }
 0x4e0   :  { %1395 = vmatmul.mubr.msk.f32.vlgmr.msra.gmra.mxu0 %vm131_vm1, %v301_v12 }
 0x4e1   :  { %1398 = vmatpush3.xpose.msk.msra.mxu0 %vm47_vm0, %v548_v48  ;;  %1401 = vmatprep.mubr.msk.f32.mxu0 %vm47_vm0, %v512_v3  ;;  %v486_v48 = vld [vmem:[%s2150_s7 + $0x38] sm:$0xff]  ;;  %v485_v3 = vld [vmem:[%s2150_s7 + $0x30] sm:$0xff] }
 0x4e2   :  { %1399 = vmatprep.subr.msk.mxu0 %vm47_vm0, %v546_v50 }
 0x4e3   :  { %v526_v17 = vpop.permute.xlu0 %525  ;;  %v528_v13 = vpop.permute.xlu1 %527 }
 0x4e5   :  { %1400 = vmatpush3.xpose.msk.msra.mxu0 %vm47_vm0, %v546_v50 }
 0x4e7   :  { %v530_v18 = vpop.permute.xlu0 %529  ;;  %v532_v19 = vpop.permute.xlu1 %531 }
 0x4e8   :  { %1402 = vmatmul.mubr.msk.f32.vlgmr.msra.gmra.mxu0 %vm47_vm0, %v514_v5 }
 0x4e9   :  { %1404 = vmatprep.mubr.msk.f32.mxu0 %vm47_vm0, %v516_v7 }
 0x4eb   :  { %v534_v20 = vpop.permute.xlu0 %533  ;;  %v536_v21 = vpop.permute.xlu1 %535 }
 0x4ec   :  { %1405 = vmatmul.mubr.msk.f32.gmra.mxu0 %vm47_vm0, %v518_v14 }
 0x4ed   :  { %1407 = vmatprep.mubr.msk.f32.mxu0 %vm47_vm0, %v520_v15  ;;  %v487_v15 = vld [vmem:[%s2150_s7 + $0x40] sm:$0xff] }
 0x4ef   :  { %v538_v22 = vpop.permute.xlu0 %537  ;;  %v540_v23 = vpop.permute.xlu1 %539 }
 0x4f0   :  { %1408 = vmatmul.mubr.msk.f32.gmra.mxu0 %vm47_vm0, %v522_v16 }
 0x4f1   :  { %1410 = vmatprep.mubr.msk.f32.mxu0 %vm47_vm0, %v524_v11 }
 0x4f3   :  { %v542_v24 = vpop.permute.xlu0 %541 }
 0x4f4   :  { %1411 = vmatmul.mubr.msk.f32.gmra.mxu0 %vm47_vm0, %v526_v17 }
 0x4f5   :  { %1413 = vmatprep.mubr.msk.f32.mxu0 %vm47_vm0, %v528_v13 }
 0x4f8   :  { %1414 = vmatmul.mubr.msk.f32.gmra.mxu0 %vm47_vm0, %v530_v18  ;;  %v490_v18 = vld [vmem:[%s2150_s7 + $0x58] sm:$0xff] }
 0x4f9   :  { %1416 = vmatprep.mubr.msk.f32.mxu0 %vm47_vm0, %v532_v19 }
 0x4fc   :  { %1417 = vmatmul.mubr.msk.f32.gmra.mxu0 %vm47_vm0, %v534_v20 }
 0x4fd   :  { %1419 = vmatprep.mubr.msk.f32.mxu0 %vm47_vm0, %v536_v21  ;;  %v489_v21 = vld [vmem:[%s2150_s7 + $0x50] sm:$0xff] }
 0x500   :  { %1420 = vmatmul.mubr.msk.f32.gmra.mxu0 %vm47_vm0, %v538_v22 }
 0x501   :  { %1422 = vmatprep.mubr.msk.f32.mxu0 %vm47_vm0, %v540_v23 }
 0x504   :  { %1423 = vmatmul.mubr.msk.f32.gmra.mxu0 %vm47_vm0, %v542_v24 }
 0x5a0   :  { %v1867_v25 = vpop.f32.mrf.mxu0 }
 0x5a2   :  { %v1869_v26 = vpop.f32.mrf.mxu0 }
 0x5a8   :  { %v1403_v28 = vpop.f32.mrf.mxu0 }
 0x5a9   :  { %v1877_v30 = vadd.f32 %v1403_v28, %v480_v27  ;;  %v492_v28 = vld [vmem:[%s2150_s7 + $0x68] sm:$0xff] }
 0x5aa   :  { %v651_v31 = vpop.f32.mrf.mxu0 }
 0x5ab   :  { %v1882_v33 = vadd.f32 %v651_v31, %v479_v29  ;;  %v733_v34 = vsel %vm131_vm1, %v1877_v30, -inf }
 0x5ac   :  { %734 = vmax.xlane.f32.xlu0 %v733_v34  ;;  %v1406_v35 = vpop.f32.mrf.mxu0 }
 0x5ad   :  { %v1889_v37 = vadd.f32 %v1406_v35, %v482_v32  ;;  %v730_v38 = vsel %vm131_vm1, %v1882_v33, -inf  ;;  %v491_v32 = vld [vmem:[%s2150_s7 + $0x60] sm:$0xff] }
 0x5ae   :  { %731 = vmax.xlane.f32.xlu1 %v730_v38  ;;  %v661_v39 = vpop.f32.mrf.mxu0 }
 0x5af   :  { %v1896_v41 = vadd.f32 %v661_v39, %v481_v36  ;;  %v739_v45 = vsel %vm131_vm1, %v1889_v37, -inf  ;;  %v494_v39 = vld [vmem:[%s2150_s7 + $0x78] sm:$0xff] }
 0x5b0   :  { %v1409_v42 = vpop.f32.mrf.mxu0 }
 0x5b1   :  { %v1901_v44 = vadd.f32 %v1409_v42, %v484_v40  ;;  %v736_v46 = vsel %vm131_vm1, %v1896_v41, -inf }
 0x5b2   :  { %740 = vmax.xlane.f32.xlu1 %v739_v45  ;;  %737 = vmax.xlane.f32.xlu0 %v736_v46  ;;  %v671_v47 = vpop.f32.mrf.mxu0 }
 0x5b3   :  { %v1910_v49 = vadd.f32 %v671_v47, %v483_v43  ;;  %v745_v5 = vsel %vm131_vm1, %v1901_v44, -inf  ;;  %v493_v43 = vld [vmem:[%s2150_s7 + $0x70] sm:$0xff]  ;;  %s1574_s7 = smov 48  }
 0x5b4   :  { %v1412_v50 = vpop.f32.mrf.mxu0 }
 0x5b5   :  { %v1915_v4 = vadd.f32 %v1412_v50, %v486_v48  ;;  %v742_v6 = vsel %vm131_vm1, %v1910_v49, -inf }
 0x5b6   :  { %746 = vmax.xlane.f32.xlu1 %v745_v5  ;;  %743 = vmax.xlane.f32.xlu0 %v742_v6  ;;  %v681_v7 = vpop.f32.mrf.mxu0 }
 0x5b7   :  { %v1924_v12 = vadd.f32 %v681_v7, %v485_v3  ;;  %v751_v11 = vsel %vm131_vm1, %v1915_v4, -inf }
 0x5b8   :  { %v1415_v14 = vpop.f32.mrf.mxu0 }
 0x5b9   :  { %v1929_v16 = vadd.f32 %v1415_v14, %v488_v9  ;;  %v748_v17 = vsel %vm131_vm1, %v1924_v12, -inf }
 0x5ba   :  { %752 = vmax.xlane.f32.xlu1 %v751_v11  ;;  %749 = vmax.xlane.f32.xlu0 %v748_v17  ;;  %v691_v13 = vpop.f32.mrf.mxu0 }
 0x5bb   :  { %v1938_v19 = vadd.f32 %v691_v13, %v487_v15  ;;  %v757_v23 = vsel %vm131_vm1, %v1929_v16, -inf }
 0x5bc   :  { %v1418_v20 = vpop.f32.mrf.mxu0 }
 0x5bd   :  { %v1943_v22 = vadd.f32 %v1418_v20, %v490_v18  ;;  %v754_v24 = vsel %vm131_vm1, %v1938_v19, -inf }
 0x5be   :  { %758 = vmax.xlane.f32.xlu1 %v757_v23  ;;  %755 = vmax.xlane.f32.xlu0 %v754_v24  ;;  %v701_v27 = vpop.f32.mrf.mxu0 }
 0x5bf   :  { %v1952_v29 = vadd.f32 %v701_v27, %v489_v21  ;;  %v763_v35 = vsel %vm131_vm1, %v1943_v22, -inf }
 0x5c0   :  { %v1421_v31 = vpop.f32.mrf.mxu0 }
 0x5c1   :  { %v1957_v34 = vadd.f32 %v1421_v31, %v492_v28  ;;  %v760_v36 = vsel %vm131_vm1, %v1952_v29, -inf }
 0x5c2   :  { %764 = vmax.xlane.f32.xlu1 %v763_v35  ;;  %761 = vmax.xlane.f32.xlu0 %v760_v36  ;;  %v711_v38 = vpop.f32.mrf.mxu0 }
 0x5c3   :  { %v1966_v40 = vadd.f32 %v711_v38, %v491_v32  ;;  %v769_v46 = vsel %vm131_vm1, %v1957_v34, -inf }
 0x5c4   :  { %v1424_v42 = vpop.f32.mrf.mxu0 }
 0x5c5   :  { %v1971_v45 = vadd.f32 %v1424_v42, %v494_v39  ;;  %v766_v47 = vsel %vm131_vm1, %v1966_v40, -inf }
 0x5c6   :  { %770 = vmax.xlane.f32.xlu1 %v769_v46  ;;  %767 = vmax.xlane.f32.xlu0 %v766_v47  ;;  %v721_v48 = vpop.f32.mrf.mxu0 }
 0x5c7   :  { %v1977_v50 = vadd.f32 %v721_v48, %v493_v43  ;;  %v775_v3 = vsel %vm131_vm1, %v1971_v45, -inf }
 0x5c9   :  { %v772_v5 = vsel %vm131_vm1, %v1977_v50, -inf }
 0x5ca   :  { %776 = vmax.xlane.f32.xlu1 %v775_v3  ;;  %773 = vmax.xlane.f32.xlu0 %v772_v5 }
 0x635   :  { %v735_v6 = vpop.xlane.xlu0 %734 }
 0x636   :  { %v779_v7 = vsub.f32 %v1877_v30, %v735_v6 }
 0x637   :  { %v732_v9 = vpop.xlane.xlu1 %731 }
 0x638   :  { %v796_v14 = vmul.f32 1.442695, %v779_v7  ;;  %v778_v15 = vsub.f32 %v1882_v33, %v732_v9 }
 0x63a   :  { %1484 = vpow2.f32 %v796_v14  ;;  %v794_v11 = vmul.f32 1.442695, %v778_v15 }
 0x63b   :  { %v738_v17 = vpop.xlane.xlu0 %737  ;;  %v741_v13 = vpop.xlane.xlu1 %740 }
 0x63c   :  { %1486 = vpow2.f32 %v794_v11  ;;  %v780_v18 = vsub.f32 %v1896_v41, %v738_v17  ;;  %v781_v20 = vsub.f32 %v1889_v37, %v741_v13 }
 0x63e   :  { %v798_v21 = vmul.f32 1.442695, %v780_v18  ;;  %v800_v23 = vmul.f32 1.442695, %v781_v20 }
 0x63f   :  { %v744_v24 = vpop.xlane.xlu0 %743  ;;  %v747_v27 = vpop.xlane.xlu1 %746 }
 0x640   :  { %1488 = vpow2.f32 %v798_v21  ;;  %v782_v30 = vsub.f32 %v1910_v49, %v744_v24  ;;  %v783_v28 = vsub.f32 %v1901_v44, %v747_v27 }
 0x641   :  { %1490 = vpow2.f32 %v800_v23 }
 0x642   :  { %v802_v33 = vmul.f32 1.442695, %v782_v30  ;;  %v804_v31 = vmul.f32 1.442695, %v783_v28 }
 0x643   :  { %v750_v32 = vpop.xlane.xlu0 %749  ;;  %v753_v35 = vpop.xlane.xlu1 %752 }
 0x644   :  { %1492 = vpow2.f32 %v802_v33  ;;  %v784_v36 = vsub.f32 %v1924_v12, %v750_v32  ;;  %v785_v41 = vsub.f32 %v1915_v4, %v753_v35 }
 0x645   :  { %1494 = vpow2.f32 %v804_v31 }
 0x646   :  { %v806_v37 = vmul.f32 1.442695, %v784_v36  ;;  %v808_v38 = vmul.f32 1.442695, %v785_v41 }
 0x647   :  { %v1991_v39 = vpop.eup %1484  ;;  %v756_v42 = vpop.xlane.xlu0 %755 }
 0x648   :  { %v759_v43 = vpop.xlane.xlu1 %758  ;;  %1496 = vpow2.f32 %v806_v37  ;;  %v786_v44 = vsub.f32 %v1938_v19, %v756_v42  ;;  %v829_v46 = vsel %vm131_vm1, %v1991_v39, 0.0 }
 0x649   :  { %v787_v49 = vsub.f32 %v1929_v16, %v759_v43  ;;  %v1997_v47 = vpop.eup %1486  ;;  %1498 = vpow2.f32 %v808_v38  ;;  %830 = vadd.xlane.f32.xlu1 %v829_v46 }
 0x64a   :  { %v810_v4 = vmul.f32 1.442695, %v786_v44  ;;  %v826_v48 = vsel %vm131_vm1, %v1997_v47, 0.0 }
 0x64b   :  { %v812_v12 = vmul.f32 1.442695, %v787_v49  ;;  %v762_v3 = vpop.xlane.xlu0 %761  ;;  %827 = vadd.xlane.f32.xlu0 %v826_v48 }
 0x64c   :  { %v765_v5 = vpop.xlane.xlu1 %764  ;;  %1500 = vpow2.f32 %v810_v4  ;;  %v788_v19 = vsub.f32 %v1952_v29, %v762_v3 }
 0x64d   :  { %v789_v16 = vsub.f32 %v1943_v22, %v765_v5  ;;  %v2003_v6 = vpop.eup %1488  ;;  %1502 = vpow2.f32 %v812_v12 }
 0x64e   :  { %v2005_v7 = vpop.eup %1490  ;;  %v814_v9 = vmul.f32 1.442695, %v788_v19  ;;  %v832_v15 = vsel %vm131_vm1, %v2003_v6, 0.0 }
 0x64f   :  { %v816_v14 = vmul.f32 1.442695, %v789_v16  ;;  %v768_v11 = vpop.xlane.xlu0 %767  ;;  %833 = vadd.xlane.f32.xlu0 %v832_v15  ;;  %v835_v17 = vsel %vm131_vm1, %v2005_v7, 0.0 }
 0x650   :  { %v771_v13 = vpop.xlane.xlu1 %770  ;;  %1504 = vpow2.f32 %v814_v9  ;;  %v790_v29 = vsub.f32 %v1966_v40, %v768_v11  ;;  %836 = vadd.xlane.f32.xlu1 %v835_v17 }
 0x651   :  { %v791_v22 = vsub.f32 %v1957_v34, %v771_v13  ;;  %v2013_v18 = vpop.eup %1492  ;;  %1506 = vpow2.f32 %v816_v14 }
 0x652   :  { %v2015_v20 = vpop.eup %1494  ;;  %v818_v21 = vmul.f32 1.442695, %v790_v29  ;;  %v838_v24 = vsel %vm131_vm1, %v2013_v18, 0.0 }
 0x653   :  { %v820_v23 = vmul.f32 1.442695, %v791_v22  ;;  %839 = vadd.xlane.f32.xlu0 %v838_v24  ;;  %v841_v27 = vsel %vm131_vm1, %v2015_v20, 0.0  ;;  %v774_v4 = vpop.xlane.xlu0 %773 }
 0x654   :  { %1508 = vpow2.f32 %v818_v21  ;;  %842 = vadd.xlane.f32.xlu1 %v841_v27  ;;  %v777_v46 = vpop.xlane.xlu1 %776  ;;  %v792_v48 = vsub.f32 %v1977_v50, %v774_v4 }
 0x655   :  { %v2021_v40 = vpop.eup %1496  ;;  %1510 = vpow2.f32 %v820_v23  ;;  %v793_v12 = vsub.f32 %v1971_v45, %v777_v46 }
 0x656   :  { %v2023_v34 = vpop.eup %1498  ;;  %v844_v30 = vsel %vm131_vm1, %v2021_v40, 0.0  ;;  %v822_v5 = vmul.f32 1.442695, %v792_v48 }
 0x657   :  { %845 = vadd.xlane.f32.xlu0 %v844_v30  ;;  %v847_v28 = vsel %vm131_vm1, %v2023_v34, 0.0  ;;  %v824_v3 = vmul.f32 1.442695, %v793_v12 }
 0x658   :  { %848 = vadd.xlane.f32.xlu1 %v847_v28 }
 0x659   :  { %v2029_v33 = vpop.eup %1500  ;;  %1512 = vpow2.f32 %v824_v3 }
 0x65a   :  { %v2031_v31 = vpop.eup %1502  ;;  %v850_v32 = vsel %vm131_vm1, %v2029_v33, 0.0  ;;  %1514 = vpow2.f32 %v822_v5 }
 0x65b   :  { %851 = vadd.xlane.f32.xlu0 %v850_v32  ;;  %v853_v35 = vsel %vm131_vm1, %v2031_v31, 0.0 }
 0x65c   :  { %854 = vadd.xlane.f32.xlu1 %v853_v35 }
 0x65d   :  { %v2037_v36 = vpop.eup %1504 }
 0x65e   :  { %v2039_v41 = vpop.eup %1506  ;;  %v856_v37 = vsel %vm131_vm1, %v2037_v36, 0.0 }
 0x65f   :  { %857 = vadd.xlane.f32.xlu0 %v856_v37  ;;  %v859_v38 = vsel %vm131_vm1, %v2039_v41, 0.0 }
 0x660   :  { %860 = vadd.xlane.f32.xlu1 %v859_v38 }
 0x661   :  { %v2045_v42 = vpop.eup %1508 }
 0x662   :  { %v2047_v43 = vpop.eup %1510  ;;  %v862_v44 = vsel %vm131_vm1, %v2045_v42, 0.0 }
 0x663   :  { %863 = vadd.xlane.f32.xlu0 %v862_v44  ;;  %v865_v49 = vsel %vm131_vm1, %v2047_v43, 0.0 }
 0x664   :  { %866 = vadd.xlane.f32.xlu1 %v865_v49 }
 0x666   :  { %v2057_v19 = vpop.eup %1512 }
 0x667   :  { %v2059_v16 = vpop.eup %1514  ;;  %v871_v9 = vsel %vm131_vm1, %v2057_v19, 0.0 }
 0x675   :  { %906 = vrot.lane.b32.xlu1 %v1653_v10, %s1574_s7 }
 0x679   :  { %908 = vrot.lane.b32.xlu0 %v1651_v8, %s1574_s7  ;;  %v868_v8 = vsel %vm131_vm1, %v2059_v16, 0.0 }
 0x698   :  { %872 = vadd.xlane.f32.xlu0 %v871_v9 }
 0x699   :  { %869 = vadd.xlane.f32.xlu1 %v868_v8 }
 0x6d2   :  { %v831_v45 = vpop.xlane.xlu1 %830 }
 0x6d4   :  { %v828_v10 = vpop.xlane.xlu0 %827 }
 0x6d5   :  { %1516 = vrcp.f32 %v828_v10 }
 0x6d6   :  { %1518 = vrcp.f32 %v831_v45 }
 0x6d8   :  { %v834_v50 = vpop.xlane.xlu0 %833 }
 0x6d9   :  { %v837_v14 = vpop.xlane.xlu1 %836  ;;  %1520 = vrcp.f32 %v834_v50 }
 0x6da   :  { %1522 = vrcp.f32 %v837_v14 }
 0x6dc   :  { %v840_v15 = vpop.xlane.xlu0 %839 }
 0x6dd   :  { %v843_v11 = vpop.xlane.xlu1 %842  ;;  %1524 = vrcp.f32 %v840_v15 }
 0x6de   :  { %1526 = vrcp.f32 %v843_v11 }
 0x6e0   :  { %v846_v17 = vpop.xlane.xlu0 %845 }
 0x6e1   :  { %v849_v13 = vpop.xlane.xlu1 %848  ;;  %1528 = vrcp.f32 %v846_v17 }
 0x6e2   :  { %v1517_v29 = vpop.eup %1516  ;;  %1530 = vrcp.f32 %v849_v13 }
 0x6e3   :  { %v890_v22 = vmul.f32 %v1517_v29, %v1997_v47  ;;  %v1519_v32 = vpop.eup %1518 }
 0x6e4   :  { %v852_v21 = vpop.xlane.xlu0 %851  ;;  %v891_v38 = vmul.f32 %v1519_v32, %v1991_v39 }
 0x6e5   :  { %v855_v23 = vpop.xlane.xlu1 %854  ;;  %1429 = vmatprep.mubr.msk.f32.mxu1 %vm131_vm1, %v890_v22  ;;  %1532 = vrcp.f32 %v852_v21 }
 0x6e6   :  { %v1521_v37 = vpop.eup %1520  ;;  %1534 = vrcp.f32 %v855_v23 }
 0x6e7   :  { %v1523_v44 = vpop.eup %1522  ;;  %v892_v49 = vmul.f32 %v1521_v37, %v2003_v6 }
 0x6e8   :  { %v858_v24 = vpop.xlane.xlu0 %857  ;;  %v893_v4 = vmul.f32 %v1523_v44, %v2005_v7 }
 0x6e9   :  { %v861_v27 = vpop.xlane.xlu1 %860  ;;  %1536 = vrcp.f32 %v858_v24 }
 0x6ea   :  { %v1525_v46 = vpop.eup %1524  ;;  %1538 = vrcp.f32 %v861_v27 }
 0x6eb   :  { %v1527_v12 = vpop.eup %1526  ;;  %v894_v48 = vmul.f32 %v1525_v46, %v2013_v18 }
 0x6ec   :  { %v864_v30 = vpop.xlane.xlu0 %863  ;;  %v895_v6 = vmul.f32 %v1527_v12, %v2015_v20 }
 0x6ed   :  { %v867_v28 = vpop.xlane.xlu1 %866  ;;  %1540 = vrcp.f32 %v864_v30 }
 0x6ee   :  { %v1529_v39 = vpop.eup %1528  ;;  %1542 = vrcp.f32 %v867_v28 }
 0x6ef   :  { %v1531_v3 = vpop.eup %1530  ;;  %v896_v5 = vmul.f32 %v1529_v39, %v2021_v40 }
 0x6f0   :  { %v909_v35 = vpop.permute.xlu0 %908  ;;  %v897_v7 = vmul.f32 %v1531_v3, %v2023_v34 }
 0x6f1   :  { %1425 = vmatprep.subr.mxu1 %v909_v35  ;;  %v907_v47 = vpop.permute.xlu1 %906 }
 0x6f2   :  { %1426 = vmatpush3.msra.mxu1 %v909_v35  ;;  %v1533_v9 = vpop.eup %1532 }
 0x6f3   :  { %1427 = vmatprep.subr.mxu1 %v907_v47  ;;  %v1535_v8 = vpop.eup %1534  ;;  %v898_v18 = vmul.f32 %v1533_v9, %v2029_v33 }
 0x6f4   :  { %1428 = vmatpush3.msra.mxu1 %v907_v47  ;;  %v899_v20 = vmul.f32 %v1535_v8, %v2031_v31 }
 0x6f5   :  { %1430 = vmatmul.mubr.msk.f32.vlgmr.msra.gmra.mxu1 %vm131_vm1, %v891_v38 }
 0x6f6   :  { %1432 = vmatprep.mubr.msk.f32.mxu1 %vm131_vm1, %v892_v49  ;;  %v1537_v10 = vpop.eup %1536 }
 0x6f7   :  { %v1539_v45 = vpop.eup %1538  ;;  %v900_v40 = vmul.f32 %v1537_v10, %v2037_v36 }
 0x6f8   :  { %v901_v34 = vmul.f32 %v1539_v45, %v2039_v41 }
 0x6f9   :  { %1433 = vmatmul.mubr.msk.f32.gmra.mxu1 %vm131_vm1, %v893_v4 }
 0x6fa   :  { %1435 = vmatprep.mubr.msk.f32.mxu1 %vm131_vm1, %v894_v48  ;;  %v1541_v50 = vpop.eup %1540 }
 0x6fb   :  { %v1543_v14 = vpop.eup %1542  ;;  %v902_v33 = vmul.f32 %v1541_v50, %v2045_v42  ;;  %v1138_v42 = vld [vmem:[%s2147_s4 + $0x18] sm:$0xff] }
 0x6fc   :  { %v903_v15 = vmul.f32 %v1543_v14, %v2047_v43  ;;  %v1137_v43 = vld [vmem:[%s2147_s4 + $0x10] sm:$0xff]  ;;  %1453 = vmatprep.subr.mxu0 %v1138_v42 }
 0x6fd   :  { %1436 = vmatmul.mubr.msk.f32.gmra.mxu1 %vm131_vm1, %v895_v6  ;;  %1454 = vmatpush3.msra.mxu0 %v1138_v42 }
 0x6fe   :  { %1438 = vmatprep.mubr.msk.f32.mxu1 %vm131_vm1, %v896_v5  ;;  %1455 = vmatprep.subr.mxu0 %v1137_v43 }
 0x6ff   :  { %1456 = vmatpush3.msra.mxu0 %v1137_v43 }
 0x701   :  { %1439 = vmatmul.mubr.msk.f32.gmra.mxu1 %vm131_vm1, %v897_v7 }
 0x702   :  { %1441 = vmatprep.mubr.msk.f32.mxu1 %vm131_vm1, %v898_v18 }
 0x705   :  { %1442 = vmatmul.mubr.msk.f32.gmra.mxu1 %vm131_vm1, %v899_v20 }
 0x706   :  { %1444 = vmatprep.mubr.msk.f32.mxu1 %vm131_vm1, %v900_v40 }
 0x709   :  { %1445 = vmatmul.mubr.msk.f32.gmra.mxu1 %vm131_vm1, %v901_v34 }
 0x70a   :  { %1447 = vmatprep.mubr.msk.f32.mxu1 %vm131_vm1, %v902_v33 }
 0x70d   :  { %1448 = vmatmul.mubr.msk.f32.gmra.mxu1 %vm131_vm1, %v903_v15 }
 0x721   :  { %v873_v31 = vpop.xlane.xlu0 %872 }
 0x722   :  { %1544 = vrcp.f32 %v873_v31  ;;  %v870_v36 = vpop.xlane.xlu1 %869 }
 0x723   :  { %1546 = vrcp.f32 %v870_v36 }
 0x72f   :  { %v1545_v11 = vpop.eup %1544 }
 0x730   :  { %v1547_v17 = vpop.eup %1546  ;;  %v905_v13 = vmul.f32 %v1545_v11, %v2057_v19  ;;  %v1136_v19 = vld [vmem:[%s2147_s4 + $0x8] sm:$0xff] }
 0x731   :  { %v904_v41 = vmul.f32 %v1547_v17, %v2059_v16  ;;  %v1135_v16 = vld [vmem:[%s2147_s4] sm:$0xff]  ;;  %1457 = vmatprep.subr.mxu0 %v1136_v19 }
 0x732   :  { %1458 = vmatpush3.msra.mxu0 %v1136_v19 }
 0x733   :  { %1450 = vmatprep.mubr.msk.f32.mxu1 %vm131_vm1, %v904_v41  ;;  %1459 = vmatprep.subr.mxu0 %v1135_v16 }
 0x734   :  { %1451 = vmatmul.mubr.msk.f32.gmra.mxu1 %vm131_vm1, %v905_v13  ;;  %1460 = vmatpush3.msra.mxu0 %v1135_v16 }
 0x7b5   :  { %v1431_v29 = vpop.f32.mrf.mxu1 }
 0x7b6   :  { %v1106_v4 = vmul.f32 %v1431_v29, %v1692_v51 }
 0x7b7   :  { %v1026_v22 = vpop.f32.mrf.mxu1 }
 0x7b8   :  { %v1105_v49 = vmul.f32 %v1026_v22, %v1711_v54 }
 0x7b9   :  { %v1434_v21 = vpop.f32.mrf.mxu1 }
 0x7ba   :  { %v1108_v44 = vmul.f32 %v1434_v21, %v1725_v56 }
 0x7bb   :  { %v1036_v23 = vpop.f32.mrf.mxu1 }
 0x7bc   :  { %v1107_v38 = vmul.f32 %v1036_v23, %v1699_v52  ;;  %v1122_v3 = vadd.f32 %v1108_v44, %v1106_v4 }
 0x7bd   :  { %v1437_v24 = vpop.f32.mrf.mxu1 }
 0x7be   :  { %v1110_v12 = vmul.f32 %v1437_v24, %v1739_v58  ;;  %v1121_v39 = vadd.f32 %v1107_v38, %v1105_v49 }
 0x7bf   :  { %v1046_v27 = vpop.f32.mrf.mxu1 }
 0x7c0   :  { %v1109_v46 = vmul.f32 %v1046_v27, %v1706_v53  ;;  %v1124_v7 = vadd.f32 %v1122_v3, %v1110_v12 }
 0x7c1   :  { %v1440_v30 = vpop.f32.mrf.mxu1 }
 0x7c2   :  { %v1112_v5 = vmul.f32 %v1440_v30, %v1753_v60  ;;  %v1123_v9 = vadd.f32 %v1121_v39, %v1109_v46 }
 0x7c3   :  { %v1056_v28 = vpop.f32.mrf.mxu1 }
 0x7c4   :  { %v1111_v6 = vmul.f32 %v1056_v28, %v1720_v55  ;;  %v1126_v51 = vadd.f32 %v1124_v7, %v1112_v5 }
 0x7c5   :  { %v1443_v32 = vpop.f32.mrf.mxu1 }
 0x7c6   :  { %v1114_v56 = vmul.f32 %v1443_v32, %v1767_v62  ;;  %v1125_v8 = vadd.f32 %v1123_v9, %v1111_v6 }
 0x7c7   :  { %v1066_v35 = vpop.f32.mrf.mxu1 }
 0x7c8   :  { %v1113_v52 = vmul.f32 %v1066_v35, %v1734_v57  ;;  %v1128_v55 = vadd.f32 %v1126_v51, %v1114_v56 }
 0x7c9   :  { %v1446_v37 = vpop.f32.mrf.mxu1 }
 0x7ca   :  { %v1116_v58 = vmul.f32 %v1446_v37, %v1781_v0  ;;  %v1127_v18 = vadd.f32 %v1125_v8, %v1113_v52 }
 0x7cb   :  { %v1076_v47 = vpop.f32.mrf.mxu1 }
 0x7cc   :  { %v1115_v53 = vmul.f32 %v1076_v47, %v1748_v59  ;;  %v1130_v40 = vadd.f32 %v1128_v55, %v1116_v58 }
 0x7cd   :  { %v1449_v48 = vpop.f32.mrf.mxu1 }
 0x7ce   :  { %v1118_v20 = vmul.f32 %v1449_v48, %v1776_v63  ;;  %v1129_v45 = vadd.f32 %v1127_v18, %v1115_v53  ;;  %v1228_v63 = vstv %s2151_s8 }
 0x7cf   :  { %v1086_v54 = vpop.f32.mrf.mxu1  ;;  %v1230_v31 = vmul.f32 %v1867_v25, %v1228_v63  ;;  %v1229_v17 = vmul.f32 %v1228_v63, %v1869_v26 }
 0x7d0   :  { %v1117_v10 = vmul.f32 %v1086_v54, %v1762_v61  ;;  %v1132_v14 = vadd.f32 %v1130_v40, %v1118_v20  ;;  %v1302_v61 = vld [vmem:[%s2148_s5] ss:$0 sm:$0xff]  ;;  %s1548_s5 = scalar_lea.vmem %s1245_s10, 256 }
 0x7d1   :  { %p1549_p0 = scmp.ne.s32.totalorder %s1245_s10, %s1548_s5  ;;  %p1554_p2 = scmp.lt.s32.totalorder %s1548_s5, %s1548_s5 }
 0x7d2   :  { %v1131_v62 = vadd.f32 %v1129_v45, %v1117_v10 }
 0x7d3   :  { %p1555_p3 = por %p1554_p2, %p1553_p1 }
 0x7d5   :  { %p1556_p4 = pnand %p1555_p3, %p1549_p0 }
 0x7f4   :  { %v1452_v60 = vpop.f32.mrf.mxu1 }
 0x7f5   :  { %v1120_v57 = vmul.f32 %v1452_v60, %v1790_v1  ;;  %v1232_v1 = vstv %s1231_s26 }
 0x7f6   :  { %v1096_v50 = vpop.f32.mrf.mxu1 }
 0x7f7   :  { %v1119_v34 = vmul.f32 %v1096_v50, %v1795_v2  ;;  %v1134_v33 = vadd.f32 %v1132_v14, %v1120_v57 }
 0x7f9   :  { %v1133_v59 = vadd.f32 %v1131_v62, %v1119_v34 }
 0x7fb   :  { %1461 = vmatprep.mubr.msk.f32.mxu0 %vm47_vm0, %v1133_v59 }
 0x7fc   :  { %1462 = vmatmul.mubr.msk.f32.vlgmr.msra.gmra.mxu0 %vm47_vm0, %v1134_v33 }
 0x8bc   :  { %v1463_v0 = vpop.f32.mrf.mxu0 }
 0x8bd   :  { %v1224_v2 = vadd.f32 %v1463_v0, %v1302_v61 }
 0x8be   :  { %v1218_v15 = vpop.f32.mrf.mxu0 }
 0x8bf   :  { %v1234_v36 = vmul.f32 %v1232_v1, %v1224_v2  ;;  %v1219_v11 = vadd.f32 %v1302_v61, %v1218_v15 }
 0x8c1   :  { %v1236_v13 = vadd.f32 %v1234_v36, %v1230_v31  ;;  %v1233_v41 = vmul.f32 %v1232_v1, %v1219_v11 }
 0x8c3   :  { %1238 = vst.msk [vmem:[#allocation3 + $0x8] sm:$0xff] %vm47_vm0, %v1236_v13  ;;  %v1235_v42 = vadd.f32 %v1233_v41, %v1229_v17 }
 0x8c5   :  { %1237 = vst.msk [vmem:[#allocation3] sm:$0xff] %vm47_vm0, %v1235_v42 }
 0x8c6   :  { %1559 = shalt.err (!%p1556_p4)
}
 0x8c7   :  { %s1576_s8 = smov 128   ;;  %s1577_s11 = smov 8  }
 0x8c8   :  { %1250 = dma.vmem_to_hbm [thread:$0]  %s1245_s10, 256, %s2152_s9, [#allocation4], %s1576_s8, %s1576_s8, %s1577_s11  }
 0x8c9   :  { %1568 = dma.done.wait [#allocation4], 256  }
 0x8ca   :  { %1569 = vsyncadd [#allocation4], 4294967040 }
 0x8cb   :  { %1254 = vsyncpa [#allocation4], 1 }

</bundles_post_ra>
